<compile_context>
chip_gen: v7x
topology: tpu7x:2x2x1
jax: 0.10.0
libtpu: 0.0.40
codegen_flags: <defaults>
</compile_context>

<pallas_src>
import jax
import jax.numpy as jnp
from jax.experimental import pallas as pl
from jax.experimental.pallas import tpu as pltpu

MIN_BETA = 0.001
MAX_BETA = 0.999

# below this many FLOPs, XLA's fused einsum beats kernel-launch + per-step overhead
_SMALL_PROBLEM_FLOPS = 1 << 20


def _round_up(x, m):
    return ((x + m - 1) // m) * m


def _pick_tile(dim, requested, align):
    """Largest divisor of `dim` that is <= `requested` and a multiple of `align`.
    Falls back to the full dim (always a legal block size)."""
    d = min(requested, dim)
    d -= d % align
    while d >= align:
        if dim % d == 0:
            return d
        d -= align
    return dim


def _vmem_cap_bytes():
    try:
        physical = pltpu.get_tpu_info().vmem_capacity_bytes
    except Exception:
        physical = 64 << 20  # conservative (v7x-sized) fallback
    # leave headroom for Mosaic internal scratch / semaphores
    return int(physical * 3 // 4)


def _tile_bytes(rows, cols, itemsize, sub):
    # Mosaic pads VMEM tiles to (sublane, 128) multiples
    return _round_up(rows, sub) * _round_up(cols, 128) * itemsize


# ----------------------------------------------------------------------------
# Parameter "properties" — plain JAX (fused by XLA; no kernel launch overhead)
# ----------------------------------------------------------------------------
def clamp_beta(beta):
    return jnp.clip(beta, MIN_BETA, MAX_BETA)


def clamp_p(p):
    return jnp.clip(jnp.abs(p), 0.0, 0.999)


def clamp_b(b):
    return jnp.clip(jnp.abs(b), 0.001, 1.0)


# ----------------------------------------------------------------------------
# Kernels
# ----------------------------------------------------------------------------
def _rec_native_kernel(w_ref, s_ref, o_ref):
    # w_ref: (tm, n_out)   s_ref: (n_out, tt)   o_ref: (tm, tt)
    o_ref[...] = jnp.dot(
        w_ref[...], s_ref[...], preferred_element_type=jnp.float32
    ).astype(o_ref.dtype)


def _make_rec_batched_kernel(bb):
    def kernel(w_ref, s_ref, o_ref):
        # w_ref: (tm, n_out)  s_ref: (bb, n_out, T)  o_ref: (bb, tm, T)
        w = w_ref[...]
        for b in range(bb):  # small static trip-count -> unrolled, LLO-visible
            o_ref[b] = jnp.dot(
                w, s_ref[b], preferred_element_type=jnp.float32
            ).astype(o_ref.dtype)

    return kernel


# ----------------------------------------------------------------------------
# Recurrent input:  out[b, i, t] = sum_j W[i, j] * spikes[b, j, t]
# ----------------------------------------------------------------------------
def _rec_input_native(w, spikes, out_dtype, tm_req, tn_req, sub, cap):
    """T >= 128 path: native (B, n_out, T) layout, 3-D grid (b, m, t)."""
    B, n_out, T = spikes.shape
    itemsize = jnp.dtype(spikes.dtype).itemsize
    out_itemsize = jnp.dtype(out_dtype).itemsize

    t_pad = _round_up(T, 128)
    if t_pad != T:
        spikes = jnp.pad(spikes, ((0, 0), (0, 0), (0, t_pad - T)))

    tm = _pick_tile(n_out, tm_req, sub)
    tt = _pick_tile(t_pad, max(128, tn_req), 128)

    def footprint(tm_, tt_):
        w_b = _tile_bytes(tm_, n_out, itemsize, sub)
        s_b = _tile_bytes(n_out, tt_, itemsize, sub)
        o_b = _tile_bytes(tm_, tt_, out_itemsize, sub)
        return 2 * (w_b + s_b + o_b) + (1 << 20)

    for _ in range(8):  # shrink tiles instead of over-declaring the limit
        if footprint(tm, tt) <= cap:
            break
        if tt > 128:
            tt = _pick_tile(t_pad, max(128, tt // 2), 128)
        else:
            new_tm = _pick_tile(n_out, max(sub, tm // 2), sub)
            if new_tm == tm:
                break
            tm = new_tm

    grid = (B, n_out // tm, t_pad // tt)
    vmem_limit = int(min(max(footprint(tm, tt), 32 << 20), cap))

    out = pl.pallas_call(
        _rec_native_kernel,
        out_shape=jax.ShapeDtypeStruct((B, n_out, t_pad), out_dtype),
        grid=grid,
        in_specs=[
            # W row-slab: index constant along b and t -> stays resident
            pl.BlockSpec((tm, n_out), lambda b, m, t: (m, 0)),
            # spikes column tile, native layout
            pl.BlockSpec((pl.Squeezed(), n_out, tt), lambda b, m, t: (b, 0, t)),
        ],
        out_specs=pl.BlockSpec((pl.Squeezed(), tm, tt), lambda b, m, t: (b, m, t)),
        compiler_params=pltpu.CompilerParams(
            dimension_semantics=("parallel", "parallel", "parallel"),
            vmem_limit_bytes=vmem_limit,
        ),
        cost_estimate=pl.CostEstimate(
            flops=2 * n_out * n_out * B * t_pad,
            transcendentals=0,
            bytes_accessed=itemsize * (n_out * n_out + B * n_out * t_pad)
            + out_itemsize * B * n_out * t_pad,
        ),
    )(w, spikes)

    if t_pad != T:
        out = out[:, :, :T]
    return out


def _rec_input_batched(w, spikes, out_dtype, tm_req, sub, cap):
    """T < 128 path: DMA (bb, n_out, T) raw-layout blocks, per-batch dots in-kernel."""
    B, n_out, T = spikes.shape
    itemsize = jnp.dtype(spikes.dtype).itemsize
    out_itemsize = jnp.dtype(out_dtype).itemsize

    tm = _pick_tile(n_out, tm_req, sub)
    bb = _pick_tile(B, 8, 1)  # largest divisor of B that is <= 8

    def footprint(tm_, bb_):
        w_b = _tile_bytes(tm_, n_out, itemsize, sub)
        s_b = bb_ * _tile_bytes(n_out, T, itemsize, sub)
        o_b = bb_ * _tile_bytes(tm_, T, out_itemsize, sub)
        return 2 * (w_b + s_b + o_b) + (1 << 20)

    for _ in range(8):
        if footprint(tm, bb) <= cap:
            break
        if bb > 1:
            bb = _pick_tile(B, max(1, bb // 2), 1)
        else:
            new_tm = _pick_tile(n_out, max(sub, tm // 2), sub)
            if new_tm == tm:
                break
            tm = new_tm

    grid = (B // bb, n_out // tm)
    vmem_limit = int(min(max(footprint(tm, bb), 32 << 20), cap))

    out = pl.pallas_call(
        _make_rec_batched_kernel(bb),
        out_shape=jax.ShapeDtypeStruct((B, n_out, T), out_dtype),
        grid=grid,
        in_specs=[
            pl.BlockSpec((tm, n_out), lambda bi, m: (m, 0)),
            pl.BlockSpec((bb, n_out, T), lambda bi, m: (bi, 0, 0)),
        ],
        out_specs=pl.BlockSpec((bb, tm, T), lambda bi, m: (bi, m, 0)),
        compiler_params=pltpu.CompilerParams(
            dimension_semantics=("parallel", "parallel"),
            vmem_limit_bytes=vmem_limit,
        ),
        cost_estimate=pl.CostEstimate(
            flops=2 * n_out * n_out * B * T,
            transcendentals=0,
            bytes_accessed=itemsize * (n_out * n_out + B * n_out * T)
            + out_itemsize * B * n_out * T,
        ),
    )(w, spikes)
    return out


def get_rec_input(rec_weight, spikes, *, tm=256, tn=512, use_bf16=False):
    """rec_weight: (n_out, n_out), spikes: (B, n_out, T) -> (B, n_out, T).

    out[b, i, t] = sum_j rec_weight[i, j] * spikes[b, j, t]
    """
    B, n_out, T = spikes.shape
    out_dtype = spikes.dtype

    flops = 2 * n_out * n_out * B * T
    if flops < _SMALL_PROBLEM_FLOPS:
        # launch + per-step overhead dwarfs the work; XLA's fused einsum wins
        return jnp.einsum("ij,bjt->bit", rec_weight, spikes)

    if use_bf16:
        # spikes are 0/1 so their cast is exact; only the weight loses mantissa
        rec_weight = rec_weight.astype(jnp.bfloat16)
        spikes = spikes.astype(jnp.bfloat16)
    compute_dtype = spikes.dtype
    sub = 16 if compute_dtype == jnp.bfloat16 else 8
    cap = _vmem_cap_bytes()

    if T >= 128:
        return _rec_input_native(rec_weight, spikes, out_dtype, tm, tn, sub, cap)
    return _rec_input_batched(rec_weight, spikes, out_dtype, tm, sub, cap)


# ----------------------------------------------------------------------------
# Parameter construction (deterministic, mirrors BaseSNN.__init__)
# ----------------------------------------------------------------------------
def make_base_snn_params(n_out, init_beta=1.0, init_p=1.0):
    beta = jnp.full((n_out,), init_beta, dtype=jnp.float32)
    p = jnp.full((n_out,), init_p, dtype=jnp.float32)
    b = jnp.full((n_out,), 1.8, dtype=jnp.float32)
    # init_weight(self._rec_weight, 'identity') -> identity recurrent matrix
    rec_weight = jnp.eye(n_out, dtype=jnp.float32)
    return beta, p, b, rec_weight


if __name__ == "__main__":
    key = jax.random.PRNGKey(0)
    k1, k2, k3, k4 = jax.random.split(key, 4)

    # ---- parameter "properties" (plain JAX clamps) ----
    n_out_small = 32
    beta, p, b, w_id_small = make_base_snn_params(n_out_small)
    beta_c, p_c, b_c = clamp_beta(beta), clamp_p(p), clamp_b(b)

    # ---- 1) tiny problem (small-problem einsum bypass) ----
    spikes_tiny = (jax.random.uniform(k1, (2, n_out_small, 8)) > 0.5).astype(jnp.float32)
    rec_tiny = get_rec_input(w_id_small, spikes_tiny)

    # ---- 2) native-layout Pallas path (T >= 128), f32 ----
    B, n_out, T = 2, 128, 128
    w_rand = jax.random.uniform(k2, (n_out, n_out), dtype=jnp.float32)
    spikes = (jax.random.uniform(k3, (B, n_out, T)) > 0.5).astype(jnp.float32)
    rec_f32 = get_rec_input(w_rand, spikes)
    rec_ident = get_rec_input(jnp.eye(n_out, dtype=jnp.float32), spikes)

    # ---- 3) same path with bf16 operands ----
    rec_bf16 = get_rec_input(w_rand, spikes, use_bf16=True)

    # ---- 4) small-T batched Pallas path (T < 128 but non-tiny) ----
    B2, T2 = 4, 32
    spikes_b = (jax.random.uniform(k4, (B2, n_out, T2)) > 0.5).astype(jnp.float32)
    rec_batched = get_rec_input(w_rand, spikes_b)

    jax.block_until_ready(
        (rec_tiny, rec_f32, rec_ident, rec_bf16, rec_batched, beta_c, p_c, b_c)
    )

    # ---- correctness vs plain-JAX reference ----
    ref_tiny = jnp.einsum("ij,bjt->bit", w_id_small, spikes_tiny)
    ref_f32 = jnp.einsum("ij,bjt->bit", w_rand, spikes)
    ref_batched = jnp.einsum("ij,bjt->bit", w_rand, spikes_b)

    assert jnp.allclose(rec_tiny, ref_tiny, atol=1e-6), "tiny-path mismatch"
    assert jnp.allclose(rec_f32, ref_f32, atol=1e-5), "native f32 path mismatch"
    assert jnp.allclose(rec_ident, spikes, atol=1e-5), "identity-weight mismatch"
    assert jnp.allclose(rec_bf16, ref_f32, rtol=2e-2, atol=1e-2), "bf16 path mismatch"
    assert jnp.allclose(rec_batched, ref_batched, atol=1e-5), "batched path mismatch"
    assert jnp.allclose(beta_c, jnp.clip(beta, MIN_BETA, MAX_BETA))
    assert jnp.allclose(p_c, jnp.clip(jnp.abs(p), 0.0, 0.999))
    assert jnp.allclose(b_c, jnp.clip(jnp.abs(b), 0.001, 1.0))

    print("KERNEL_OK")
</pallas_src>

<mosaic_0001>
module attributes {stable_mosaic.version = 11 : i64} {
  func.func @_rec_native_kernel(%arg0: i32, %arg1: i32, %arg2: i32, %arg3: memref<128x128xf32, #tpu.memory_space<vmem>>, %arg4: memref<1x128x128xf32, #tpu.memory_space<vmem>>, %arg5: memref<1x128x128xf32, #tpu.memory_space<vmem>>) attributes {dimension_semantics = [#tpu.dimension_semantics<parallel>, #tpu.dimension_semantics<parallel>, #tpu.dimension_semantics<parallel>], iteration_bounds = array<i64: 2, 1, 1>, scalar_prefetch = 0 : i64, scratch_operands = 0 : i64, tpu.core_type = #tpu.core_type<tc>, window_params = [{transform_indices = @transform_0, window_bounds = array<i64: 128, 128>}, {transform_indices = @transform_1, window_bounds = array<i64: 1, 128, 128>}, {transform_indices = @transform_2, window_bounds = array<i64: 1, 128, 128>}]} {
    %c0 = arith.constant 0 : index
    %c0_0 = arith.constant 0 : index
    %0 = vector.load %arg3[%c0, %c0_0] : memref<128x128xf32, #tpu.memory_space<vmem>>, vector<128x128xf32>
    %c0_1 = arith.constant 0 : index
    %c0_2 = arith.constant 0 : index
    %c0_3 = arith.constant 0 : index
    %1 = vector.load %arg4[%c0_1, %c0_2, %c0_3] : memref<1x128x128xf32, #tpu.memory_space<vmem>>, vector<1x128x128xf32>
    %2 = vector.shape_cast %1 : vector<1x128x128xf32> to vector<128x128xf32>
    %cst = arith.constant dense<0.000000e+00> : vector<128x128xf32>
    %3 = tpu.matmul %0, %2, %cst {dimension_numbers = #tpu.dot_dimension_numbers<[1], [0], [0], [1], [0, 0, 1, 1], [], []>} : vector<128x128xf32>, vector<128x128xf32>, vector<128x128xf32> -> vector<128x128xf32>
    %c0_4 = arith.constant 0 : index
    %c0_5 = arith.constant 0 : index
    %c0_6 = arith.constant 0 : index
    %4 = vector.load %arg5[%c0_4, %c0_5, %c0_6] : memref<1x128x128xf32, #tpu.memory_space<vmem>>, vector<1x128x128xf32>
    %5 = vector.shape_cast %4 : vector<1x128x128xf32> to vector<128x128xf32>
    %6 = vector.shape_cast %3 : vector<128x128xf32> to vector<1x128x128xf32>
    tpu.vector_store %arg5[%c0_4, %c0_5, %c0_6], %6 {strides = array<i32>} : memref<1x128x128xf32, #tpu.memory_space<vmem>>, vector<1x128x128xf32>,
    return
  }
  func.func @transform_0(%arg0: i32, %arg1: i32, %arg2: i32) -> (i32, i32) {
    %c0_i32 = arith.constant 0 : i32
    %c0_i32_0 = arith.constant 0 : i32
    return %arg1, %c0_i32 : i32, i32
  }
  func.func @transform_1(%arg0: i32, %arg1: i32, %arg2: i32) -> (i32, i32, i32) {
    %c0_i32 = arith.constant 0 : i32
    %c0_i32_0 = arith.constant 0 : i32
    return %arg0, %c0_i32, %arg2 : i32, i32, i32
  }
  func.func @transform_2(%arg0: i32, %arg1: i32, %arg2: i32) -> (i32, i32, i32) {
    %c0_i32 = arith.constant 0 : i32
    return %arg0, %arg1, %arg2 : i32, i32, i32
  }
}

</mosaic_0001>

<bundles_post_ra>
// kernel: tpu_custom_call.1
= control target key start
LH: loop header
LB: loop body
LE: loop exit
PB: predicated region body
PF: predicated region fallthrough
CT: control target
= control target key end

     0   :  { %7 = vsyncpa [#allocation3], 0  ;;  %s1193_s0 = inlined_call_operand.hbm [shape: f32[128,128], index: 0, kind: input, shape index: {}]   ;;  %s1194_s1 = inlined_call_operand.hbm [shape: f32[2,128,128], index: 1, kind: input, shape index: {}]   ;;  %s1195_s2 = inlined_call_operand.hbm [shape: f32[2,128,128], index: 2, kind: output, shape index: {}]  }
   0x1   :  { %8 = vsyncpa [#allocation6], 0 }
   0x2   :  { %10 = vsyncpa [#allocation6 + $0x1], 0 }
   0x3   :  { %11 = vsyncpa [#allocation4], 0 }
   0x4   :  { %13 = vsyncpa [#allocation4 + $0x1], 0  ;;  %s927_s9 = smov 0   ;;  %s929_s10 = smov 0  }
   0x5   :  { %s931_s11 = smov 0   ;;  %s933_s12 = smov 0  }
   0x6   :  { %s935_s13 = smov 0   ;;  %s937_s14 = smov 0  }
   0x7 LB: > { %s527_s15 = sadd.s32 4294967295, %s903_s14   ;;  %s528_s16 = sadd.s32 4294967294, %s903_s14   ;;  %s903_s14 = sphi %s937_s14, %s19_s14   ;;  %s899_s13 = sphi %s935_s13, %s1219_s13   ;;  %s895_s12 = sphi %s933_s12, %s1218_s12   ;;  %s891_s11 = sphi %s931_s11, %s1217_s11   ;;  %s887_s10 = sphi %s929_s10, %s1216_s10   ;;  %s883_s9 = sphi %s927_s9, %s1215_s9  }
   0x8   : > { %p86_p0 = scmp.ne.s32.totalorder %s887_s10, %s883_s9  ;;  %p961_p1 = scmp.eq.s32.totalorder %s527_s15, 0 }
   0x9   : > { %p965_p2 = scmp.eq.s32.totalorder %s527_s15, 1  ;;  %p120_p3 = scmp.eq.s32.totalorder %s528_s16, 1 }
   0xa   : > { %s1200_s17 = scalar_select %p961_p1, 1, 0 }
   0xb   : > { %s1201_s18 = scalar_select %p965_p2, 1, 0 }
   0xc   : > { %p971_p4 = por %p961_p1, %p86_p0  ;;  %p529_p5 = scmp.ge.s32.totalorder %s903_s14, 1 }
   0xd   : > { %p976_p6 = por %p120_p3, %p86_p0  ;;  %p127_p7 = scmp.lt.s32.totalorder %s903_s14, 3 }
   0xe   : > { %s1202_s19 = scalar_select %p971_p4, 1, 0 }
   0xf   : > { %s1203_s20 = scalar_select %p976_p6, 1, 0 }
  0x10   : > { %p981_p8 = pnand %p529_p5, %p127_p7  ;;  %s905_s22 = smov [#allocation2]  }
  0x11   : > { %s142_s23 = sshll.u32 %s905_s22, 4  ;;  %s38_s25 = sadd.s32 1, %s899_s13  ;;  %s143_s23 = int_to_ptr.vmem [resolvable:$true] %s142_s23 }
  0x12   : > { %s1204_s21 = scalar_select %p981_p8, 1, 0 }
  0x13   : > { %p690_p9 = pneg %p981_p8  ;;  %s759_s28 = scalar_lea.hbm %s1193_s0, 2048 }
  0x14   : > { %p760_p12 = scmp.ne.s32.totalorder %s1193_s0, %s759_s28  ;;  %p766_p5 = scmp.lt.u32.totalorder %s759_s28, %s1193_s0 }
  0x15   : > { %p990_p11 = pnand %p690_p9, %p961_p1 }
  0x17   : > { %p761_p13 = pneg %p990_p11 }
  0x19   : > { %p762_p0 = pnand %p761_p13, %p760_p12 }
  0x1b   : > { %p763_p3 = pneg %p762_p0 }
  0x1d   : > { %p768_p7 = pnand %p766_p5, %p763_p3 }
  0x1f   : > { %771 = shalt.err (!%p768_p7)
}
  0x20   : > { %s772_s5 = scalar_lea.vmem %s143_s23, 2048  ;;  %p780_p4 = scmp.lt.s32.totalorder %s143_s23, %s143_s23 }
  0x21   : > { %p773_p9 = scmp.ne.s32.totalorder %s143_s23, %s772_s5  ;;  %p781_p1 = scmp.lt.s32.totalorder %s772_s5, %s772_s5 }
  0x23   : > { %p775_p10 = pnand %p773_p9, %p761_p13  ;;  %p782_p8 = por %p781_p1, %p780_p4 }
  0x25   : > { %p776_p6 = pneg %p775_p10 }
  0x27   : > { %p783_p2 = pnand %p782_p8, %p776_p6 }
  0x29   : > { %786 = shalt.err (!%p783_p2)
}
  0x2a   : > { %s906_s6 = smov 128   ;;  %s907_s7 = smov 8  }
  0x2b   : > { %693 = dma.hbm_to_vmem [thread:$0]  (!%p990_p11), %s1193_s0, 2048, %s143_s23, [#allocation3], %s906_s6, %s906_s6, %s907_s7  }
  0x2c   : > { %p40_p1 = scmp.ge.s32.totalorder %s38_s25, 2  ;;  %s73_s16 = sadd.s32 1, %s891_s11 }
  0x2d   : > { %p80_p2 = scmp.ne.s32.totalorder %s891_s11, %s887_s10  ;;  %p81_p4 = scmp.eq.s32.totalorder %s903_s14, 0 }
  0x2e   : > { %s1221_s25 = smov (%p40_p1, %s38_s25), 0  ;;  %p1207_p8 = scmp.ne.s32.totalorder %s1201_s18, 0 }
  0x2f   : > { %p1020_p6 = por %p81_p4, %p80_p2  ;;  %s68_s26 = ssub.s32 %s899_s13, %s1221_s25 }
  0x30   : > { %p1026_p10 = por %p1207_p8, %p80_p2  ;;  %p703_p12 = scmp.lt.s32.totalorder %s903_s14, 2 }
  0x31   : > { %p71_p11 = scmp.eq.s32.totalorder %s68_s26, 0  ;;  %s156_s23 = sand.u32 1, %s891_s11  }
  0x32   : > { %s532_s27 = sshll.u32 %s156_s23, 7  ;;  %s544_s29 = sshll.u32 %s899_s13, 11 }
  0x33   : > { %s1035_s28 = scalar_select %p71_p11, %s891_s11, %s73_s16  }
  0x34   : > { %s1041_s4 = scalar_lea.hbm %s1194_s1, %s544_s29  ;;  %s160_s18 = scalar_lea.vmem [#allocation5], %s532_s27 }
  0x35   : > { %s168_s5 = sshll.u32 %s160_s18, 4  ;;  %p1047_p13 = pnand %p703_p12, %p1020_p6  ;;  %s1043_s5 = int_to_ptr.vmem [resolvable:$true] %s168_s5 }
  0x36   : > { %s1051_s15 = scalar_lea.sflag [#allocation6], %s156_s23  ;;  %s787_s16 = scalar_lea.hbm %s1041_s4, 2048 }
  0x37   : > { %p788_p0 = scmp.ne.s32.totalorder %s1041_s4, %s787_s16  ;;  %p789_p3 = pneg %p1047_p13 }
  0x38   : > { %s792_s22 = scalar_lea.hbm %s1194_s1, 4096  ;;  %p793_p9 = scmp.lt.u32.totalorder %s1041_s4, %s1194_s1 }
  0x39   : > { %p790_p5 = pnand %p789_p3, %p788_p0  ;;  %p794_p1 = scmp.lt.u32.totalorder %s792_s22, %s787_s16 }
  0x3a   : > { %p796_p4 = scmp.lt.u32.totalorder %s787_s16, %s1041_s4 }
  0x3b   : > { %p791_p7 = pneg %p790_p5  ;;  %p795_p2 = por %p794_p1, %p793_p9 }
  0x3d   : > { %p797_p6 = por %p796_p4, %p795_p2 }
  0x3f   : > { %p798_p8 = pnand %p797_p6, %p791_p7 }
  0x41   : > { %801 = shalt.err (!%p798_p8)
}
  0x42   : > { %s802_s23 = scalar_lea.vmem %s1043_s5, 2048  ;;  %s908_s3 = smov [#allocation5]  }
  0x43   : > { %p803_p12 = scmp.ne.s32.totalorder %s1043_s5, %s802_s23  ;;  %s807_s18 = sshll.u32 %s908_s3, 4  ;;  %s808_s18 = int_to_ptr.vmem [resolvable:$false] %s807_s18 }
  0x44   : > { %s809_s26 = scalar_lea.vmem %s808_s18, 4096  ;;  %p810_p5 = scmp.lt.s32.totalorder %s1043_s5, %s808_s18 }
  0x45   : > { %p805_p11 = pnand %p803_p12, %p789_p3  ;;  %p811_p9 = scmp.lt.s32.totalorder %s809_s26, %s802_s23 }
  0x47   : > { %p806_p0 = pneg %p805_p11  ;;  %p812_p1 = por %p811_p9, %p810_p5 }
  0x49   : > { %p813_p2 = pnand %p812_p1, %p806_p0 }
  0x4b   : > { %816 = shalt.err (!%p813_p2)
}
  0x4c   : > { %697 = dma.hbm_to_vmem [thread:$0]  (!%p1047_p13), %s1041_s4, 2048, %s1043_s5, %s1051_s15, %s906_s6, %s906_s6, %s907_s7  }
  0x4d   : > { %p1210_p3 = scmp.ne.s32.totalorder %s1204_s21, 0 }
  0x4e   : > { %p1211_p7 = scmp.ne.s32.totalorder (!%p1210_p3), %s1200_s17, 0 }
  0x4f   : > { %180 = sbr.rel (%p1210_p3) target bundleno = 366 (0x16e), region = 28 }
  0x56   : > { %870 = dma.done.wait (%p1211_p7), [#allocation3], 2048  }
  0x57   : > { %872 = vsyncadd (%p1211_p7), [#allocation3], 4294965248  ;;  %s1089_s16 = sand.u32 1, %s887_s10   ;;  %p1212_p13 = scmp.ne.s32.totalorder %s1202_s19, 0 }
  0x58   : > { %s537_s8 = sshll.u32 %s1089_s16, 7  ;;  %s187_s27 = scalar_lea.sflag [#allocation6], %s1089_s16 }
  0x59   : > { %s1095_s6 = scalar_lea.vmem [#allocation5], %s537_s8 }
  0x5a   : > { %874 = dma.done.wait (%p1212_p13), %s187_s27, 2048  }
  0x5b   : > { %876 = vsyncadd (%p1212_p13), %s187_s27, 4294965248  ;;  %v229_v0 = vld [vmem:[%s1095_s6] sm:$0xff]  ;;  %v230_v1 = vld [vmem:[%s1095_s6 + $0x8] sm:$0xff]  ;;  %s1119_s17 = scalar_lea.vmem [#allocation7], %s537_s8  ;;  %s545_s19 = sshll.u32 %s895_s12, 11 }
  0x5c   : > { %v231_v2 = vld [vmem:[%s1095_s6 + $0x10] sm:$0xff]  ;;  %v634_v3 = vpack.c.bf16 %v230_v1, %v229_v0  ;;  %v232_v4 = vld [vmem:[%s1095_s6 + $0x18] sm:$0xff]  ;;  %v233_v6 = vld [vmem:[%s1095_s6 + $0x20] sm:$0xff]  ;;  %s423_s21 = sshll.u32 %s1119_s17, 4  ;;  %s1138_s5 = scalar_lea.hbm %s1195_s2, %s545_s19  ;;  %s1140_s21 = int_to_ptr.vmem [resolvable:$true] %s423_s21 }
  0x5d   : > { %v638_v5 = vpack.c.bf16 %v232_v4, %v231_v2  ;;  %v234_v7 = vld [vmem:[%s1095_s6 + $0x28] sm:$0xff]  ;;  %v213_v9 = vld [vmem:[#allocation2] sm:$0xff]  ;;  %v235_v11 = vld [vmem:[%s1095_s6 + $0x30] sm:$0xff]  ;;  %s407_s12 = scalar_lea.sflag [#allocation4], %s1089_s16  ;;  %s817_s15 = scalar_lea.vmem %s1140_s21, 2048 }
  0x5e   : > { %635 = vmatprep.subr.bf16.mxu0 %v634_v3  ;;  %666 = vmatprep.subr.bf16.mxu1 %v634_v3  ;;  %v642_v8 = vpack.c.bf16 %v234_v7, %v233_v6  ;;  %v221_v10 = vld [vmem:[#allocation2 + $0x40] sm:$0xff]  ;;  %v236_v12 = vld [vmem:[%s1095_s6 + $0x38] sm:$0xff]  ;;  %v238_v15 = vld [vmem:[%s1095_s6 + $0x48] sm:$0xff]  ;;  %p818_p4 = scmp.ne.s32.totalorder %s1140_s21, %s817_s15  ;;  %s909_s22 = smov [#allocation7]  }
  0x5f   : > { %637 = vmatpush3.bf16.msra.mxu0 %v634_v3  ;;  %674 = vmatpush3.bf16.msra.mxu1 %v634_v3  ;;  %v646_v13 = vpack.c.bf16 %v236_v12, %v235_v11  ;;  %v237_v14 = vld [vmem:[%s1095_s6 + $0x40] sm:$0xff]  ;;  %v239_v17 = vld [vmem:[%s1095_s6 + $0x50] sm:$0xff]  ;;  %v240_v18 = vld [vmem:[%s1095_s6 + $0x58] sm:$0xff]  ;;  %s821_s29 = sshll.u32 %s909_s22, 4  ;;  %s822_s29 = int_to_ptr.vmem [resolvable:$false] %s821_s29 }
  0x60   : > { %639 = vmatprep.subr.bf16.mxu0 %v638_v5  ;;  %667 = vmatprep.subr.bf16.mxu1 %v638_v5  ;;  %v650_v16 = vpack.c.bf16 %v238_v15, %v237_v14  ;;  %v654_v19 = vpack.c.bf16 %v240_v18, %v239_v17  ;;  %v241_v20 = vld [vmem:[%s1095_s6 + $0x60] sm:$0xff]  ;;  %v242_v21 = vld [vmem:[%s1095_s6 + $0x68] sm:$0xff]  ;;  %v243_v23 = vld [vmem:[%s1095_s6 + $0x70] sm:$0xff]  ;;  %p819_p6 = pnand %p818_p4, %p1026_p10  ;;  %s823_s30 = scalar_lea.vmem %s822_s29, 4096 }
  0x61   : > { %610 = vmatprep.mubr.f32.mxu0 %v213_v9  ;;  %622 = vmatprep.mubr.f32.mxu1 %v221_v10  ;;  %v658_v22 = vpack.c.bf16 %v242_v21, %v241_v20  ;;  %v244_v24 = vld [vmem:[%s1095_s6 + $0x78] sm:$0xff]  ;;  %v214_v26 = vld [vmem:[#allocation2 + $0x8] sm:$0xff]  ;;  %v215_v28 = vld [vmem:[#allocation2 + $0x10] sm:$0xff]  ;;  %p824_p12 = scmp.lt.s32.totalorder %s1140_s21, %s822_s29  ;;  %p825_p11 = scmp.lt.s32.totalorder %s823_s30, %s817_s15 }
  0x62   : > { %v662_v25 = vpack.c.bf16 %v244_v24, %v243_v23  ;;  %v222_v27 = vld [vmem:[#allocation2 + $0x48] sm:$0xff]  ;;  %v223_v29 = vld [vmem:[#allocation2 + $0x50] sm:$0xff]  ;;  %v216_v30 = vld [vmem:[#allocation2 + $0x18] sm:$0xff]  ;;  %p820_p8 = pneg %p819_p6 }
  0x63   : > { %641 = vmatpush3.bf16.msra.mxu0 %v638_v5  ;;  %675 = vmatpush3.bf16.msra.mxu1 %v638_v5  ;;  %v224_v31 = vld [vmem:[#allocation2 + $0x58] sm:$0xff]  ;;  %v217_v32 = vld [vmem:[#allocation2 + $0x20] sm:$0xff]  ;;  %v218_v34 = vld [vmem:[#allocation2 + $0x28] sm:$0xff]  ;;  %p826_p0 = por %p825_p11, %p824_p12 }
  0x64   : > { %643 = vmatprep.subr.bf16.mxu0 %v642_v8  ;;  %668 = vmatprep.subr.bf16.mxu1 %v642_v8  ;;  %v225_v33 = vld [vmem:[#allocation2 + $0x60] sm:$0xff]  ;;  %v226_v35 = vld [vmem:[#allocation2 + $0x68] sm:$0xff]  ;;  %v219_v36 = vld [vmem:[#allocation2 + $0x30] sm:$0xff] }
  0x65   : > { %v227_v37 = vld [vmem:[#allocation2 + $0x70] sm:$0xff]  ;;  %v220_v38 = vld [vmem:[#allocation2 + $0x38] sm:$0xff]  ;;  %p827_p5 = pnand %p826_p0, %p820_p8 }
  0x66   : > { %v228_v39 = vld [vmem:[#allocation2 + $0x78] sm:$0xff] }
  0x67   : > { %645 = vmatpush3.bf16.msra.mxu0 %v642_v8  ;;  %676 = vmatpush3.bf16.msra.mxu1 %v642_v8 }
  0x68   : > { %647 = vmatprep.subr.bf16.mxu0 %v646_v13  ;;  %669 = vmatprep.subr.bf16.mxu1 %v646_v13 }
  0x6b   : > { %649 = vmatpush3.bf16.msra.mxu0 %v646_v13  ;;  %677 = vmatpush3.bf16.msra.mxu1 %v646_v13 }
  0x6c   : > { %651 = vmatprep.subr.bf16.mxu0 %v650_v16  ;;  %670 = vmatprep.subr.bf16.mxu1 %v650_v16 }
  0x6f   : > { %653 = vmatpush3.bf16.msra.mxu0 %v650_v16  ;;  %678 = vmatpush3.bf16.msra.mxu1 %v650_v16 }
  0x70   : > { %655 = vmatprep.subr.bf16.mxu0 %v654_v19  ;;  %671 = vmatprep.subr.bf16.mxu1 %v654_v19 }
  0x73   : > { %657 = vmatpush3.bf16.msra.mxu0 %v654_v19  ;;  %679 = vmatpush3.bf16.msra.mxu1 %v654_v19 }
  0x74   : > { %659 = vmatprep.subr.bf16.mxu0 %v658_v22  ;;  %672 = vmatprep.subr.bf16.mxu1 %v658_v22 }
  0x77   : > { %661 = vmatpush3.bf16.msra.mxu0 %v658_v22  ;;  %680 = vmatpush3.bf16.msra.mxu1 %v658_v22 }
  0x78   : > { %663 = vmatprep.subr.bf16.mxu0 %v662_v25  ;;  %673 = vmatprep.subr.bf16.mxu1 %v662_v25 }
  0x7b   : > { %665 = vmatpush3.bf16.msra.mxu0 %v662_v25  ;;  %681 = vmatpush3.bf16.msra.mxu1 %v662_v25 }
  0x7e   : > { %611 = vmatmul.mubr.f32.vlgmr.msra.gmra.mrb[0].mxu0 %v214_v26  ;;  %623 = vmatmul.mubr.f32.vlgmr.msra.gmra.mrb[0].mxu1 %v222_v27 }
  0x7f   : > { %613 = vmatprep.mubr.f32.mxu0 %v215_v28  ;;  %625 = vmatprep.mubr.f32.mxu1 %v223_v29 }
  0x82   : > { %614 = vmatmul.mubr.f32.gmra.mrb[2].mxu0 %v216_v30  ;;  %626 = vmatmul.mubr.f32.gmra.mrb[2].mxu1 %v224_v31 }
  0x83   : > { %616 = vmatprep.mubr.f32.mxu0 %v217_v32  ;;  %628 = vmatprep.mubr.f32.mxu1 %v225_v33 }
  0x86   : > { %617 = vmatmul.mubr.f32.gmra.mrb[4].mxu0 %v218_v34  ;;  %629 = vmatmul.mubr.f32.gmra.mrb[4].mxu1 %v226_v35 }
  0x87   : > { %619 = vmatprep.mubr.f32.mxu0 %v219_v36  ;;  %631 = vmatprep.mubr.f32.mxu1 %v227_v37 }
  0x8a   : > { %620 = vmatmul.mubr.f32.gmra.mrb[6].mxu0 %v220_v38  ;;  %632 = vmatmul.mubr.f32.gmra.mrb[6].mxu1 %v228_v39 }
 0x151   : > { %v612_v40 = vpop.f32.mrb[0].mxu0  ;;  %v624_v41 = vpop.f32.mrb[0].mxu1 }
 0x152   : > { %391 = vst [vmem:[%s1119_s17 + $0x8] sm:$0xff] %v612_v40  ;;  %399 = vst [vmem:[%s1119_s17 + $0x48] sm:$0xff] %v624_v41  ;;  %v311_v42 = vpop.f32.mrb[1].mxu0  ;;  %v351_v43 = vpop.f32.mrb[1].mxu1 }
 0x153   : > { %390 = vst [vmem:[%s1119_s17] sm:$0xff] %v311_v42  ;;  %398 = vst [vmem:[%s1119_s17 + $0x40] sm:$0xff] %v351_v43 }
 0x155   : > { %v615_v44 = vpop.f32.mrb[2].mxu0  ;;  %v627_v45 = vpop.f32.mrb[2].mxu1 }
 0x156   : > { %393 = vst [vmem:[%s1119_s17 + $0x18] sm:$0xff] %v615_v44  ;;  %401 = vst [vmem:[%s1119_s17 + $0x58] sm:$0xff] %v627_v45  ;;  %v321_v46 = vpop.f32.mrb[3].mxu0  ;;  %v361_v47 = vpop.f32.mrb[3].mxu1 }
 0x157   : > { %392 = vst [vmem:[%s1119_s17 + $0x10] sm:$0xff] %v321_v46  ;;  %400 = vst [vmem:[%s1119_s17 + $0x50] sm:$0xff] %v361_v47 }
 0x159   : > { %v618_v48 = vpop.f32.mrb[4].mxu0  ;;  %v630_v49 = vpop.f32.mrb[4].mxu1 }
 0x15a   : > { %395 = vst [vmem:[%s1119_s17 + $0x28] sm:$0xff] %v618_v48  ;;  %403 = vst [vmem:[%s1119_s17 + $0x68] sm:$0xff] %v630_v49  ;;  %v331_v50 = vpop.f32.mrb[5].mxu0  ;;  %v371_v51 = vpop.f32.mrb[5].mxu1 }
 0x15b   : > { %394 = vst [vmem:[%s1119_s17 + $0x20] sm:$0xff] %v331_v50  ;;  %402 = vst [vmem:[%s1119_s17 + $0x60] sm:$0xff] %v371_v51 }
 0x15d   : > { %v621_v52 = vpop.f32.mrb[6].mxu0  ;;  %v633_v53 = vpop.f32.mrb[6].mxu1 }
 0x15e   : > { %397 = vst [vmem:[%s1119_s17 + $0x38] sm:$0xff] %v621_v52  ;;  %405 = vst [vmem:[%s1119_s17 + $0x78] sm:$0xff] %v633_v53  ;;  %v341_v54 = vpop.f32.mrb[7].mxu0  ;;  %v381_v55 = vpop.f32.mrb[7].mxu1 }
 0x15f   : > { %396 = vst [vmem:[%s1119_s17 + $0x30] sm:$0xff] %v341_v54  ;;  %404 = vst [vmem:[%s1119_s17 + $0x70] sm:$0xff] %v381_v55 }
 0x160   : > { %830 = shalt.err (!%p827_p5)
}
 0x161   : > { %s831_s23 = scalar_lea.hbm %s1138_s5, 2048  ;;  %s835_s26 = scalar_lea.hbm %s1195_s2, 4096 }
 0x162   : > { %p832_p9 = scmp.ne.s32.totalorder %s1138_s5, %s831_s23  ;;  %p836_p3 = scmp.lt.u32.totalorder %s1138_s5, %s1195_s2 }
 0x163   : > { %p837_p7 = scmp.lt.u32.totalorder %s835_s26, %s831_s23  ;;  %p839_p4 = scmp.lt.u32.totalorder %s831_s23, %s1138_s5 }
 0x164   : > { %p833_p1 = pnand %p832_p9, %p1026_p10 }
 0x165   : > { %p838_p13 = por %p837_p7, %p836_p3 }
 0x166   : > { %p834_p2 = pneg %p833_p1 }
 0x167   : > { %p840_p6 = por %p839_p4, %p838_p13 }
 0x169   : > { %p841_p8 = pnand %p840_p6, %p834_p2 }
 0x16b   : > { %844 = shalt.err (!%p841_p8)
}
 0x16c   : > { %s910_s6 = smov 128   ;;  %s911_s17 = smov 8  }
 0x16d   : > { %688 = dma.vmem_to_hbm [thread:$0]  (%p1026_p10), %s1140_s21, 2048, %s1138_s5, %s407_s12, %s910_s6, %s910_s6, %s911_s17  }
 0x16e PF: > { %s438_s19 = sand.u32 1, %s883_s9   ;;  %p1213_p12 = scmp.ne.s32.totalorder %s1203_s20, 0 }
 0x16f   : > { %p1214_p11 = scmp.ge.s32.totalorder %s903_s14, 2  ;;  %s439_s7 = scalar_lea.sflag [#allocation4], %s438_s19 }
 0x171   : > { %p699_p0 = pnand %p1214_p11, %p1213_p12 }
 0x173   : > { %878 = dma.done.wait (!%p699_p0), %s439_s7, 2048  }
 0x174   : > { %880 = vsyncadd (!%p699_p0), %s439_s7, 4294965248  ;;  %s19_s14 = sadd.s32 1, %s903_s14   ;;  %s1215_s9 = smov %s887_s10 }
 0x175   : > { %p16_p5 = scmp.ge.s32.totalorder %s19_s14, 4   ;;  %s1216_s10 = smov %s891_s11 }
 0x176   : > { %s1217_s11 = smov %s1035_s28  ;;  %s1218_s12 = smov %s899_s13 }
 0x177   : > { %s1219_s13 = smov %s1221_s25  ;;  %18 = sbr.rel (!%p16_p5) target bundleno = 7 (0x7), region = 79 }
 0x17e   :  { %444 = vsyncpa [#allocation3], 1 }
 0x17f   :  { %446 = vsyncpa [#allocation3 + $0x1], 1 }
 0x180   :  { %447 = vsyncpa [#allocation6], 1 }
 0x181   :  { %449 = vsyncpa [#allocation6 + $0x1], 1 }
 0x182   :  { %450 = vsyncpa [#allocation4], 1 }
 0x183   :  { %452 = vsyncpa [#allocation4 + $0x1], 1 }

</bundles_post_ra>
